<compile_context>
chip_gen: v5e
topology: v5e:2x2
jax: 0.10.0
libtpu: 0.0.40
codegen_flags: <defaults>
</compile_context>

<pallas_src>
import math
import functools

import jax
import jax.numpy as jnp
from jax.experimental import pallas as pl
from jax.experimental.pallas import tpu as pltpu


_LANE = 128                         # lane (last) dim of the flattened 2-D slabs
_TARGET_BLOCK_BYTES = 1 << 20       # ~1 MiB per input block (bm=2048 f32 / 4096 bf16)
_VMEM_DB_INPUT_BUDGET = 24 << 20    # total double-buffered input bytes (v7x-safe)
_VMEM_LIMIT_BYTES = 48 << 20        # explicit scoped-VMEM limit (< v7x 64 MiB physical)


def _round_up(x, m):
    return -(-x // m) * m


# ----------------------------------------------------------------------------
# Generic multi-term tiled streaming-sum kernel
#   refs = (*inputs, *outs, *accs). Per grid step, each term's elem_fn maps its
#   input blocks to a (bm, 128) f32 block which is reduced to (8, 128) and added
#   to that term's resident VMEM accumulator; accumulators are written to the
#   per-split (8, 128) output blocks only on the last step.
# ----------------------------------------------------------------------------
def _multi_sum_kernel(*refs, elem_fns, input_slices, n_inputs, n_terms,
                      block_rows, steps, size_valid, need_mask):
    out_refs = refs[n_inputs:n_inputs + n_terms]
    acc_refs = refs[n_inputs + n_terms:]
    s = pl.program_id(0)
    i = pl.program_id(1)

    @pl.when(i == 0)
    def _():
        for t in range(n_terms):
            acc_refs[t][...] = jnp.zeros_like(acc_refs[t])

    if need_mask:  # only traced when the grid over-covers the valid elements
        row = jax.lax.broadcasted_iota(jnp.int32, (block_rows, _LANE), 0)
        lane = jax.lax.broadcasted_iota(jnp.int32, (block_rows, _LANE), 1)
        start_row = (s * steps + i) * block_rows
        mask = (start_row + row) * _LANE + lane < size_valid
    else:
        mask = None

    for t in range(n_terms):
        lo, hi = input_slices[t]
        vals = elem_fns[t](*[refs[k][...] for k in range(lo, hi)])
        if mask is not None:
            vals = jnp.where(mask, vals, 0.0)
        # (bm, 128) -> (8, 128) partial: pure VPU adds, hidden under the DMA stream.
        acc_refs[t][...] += vals.reshape(block_rows // 8, 8, _LANE).sum(axis=0)

    @pl.when(i == steps - 1)
    def _():
        for t in range(n_terms):
            out_refs[t][...] = acc_refs[t][...]


def _tiled_multi_sum(term_arrays, term_elem_fns, size_valid):
    """Sums over lane-dense (rows, 128) arrays, one scalar per term.

    term_arrays: list (per term) of lists of (rows, 128) arrays; all arrays share
    the same rows. size_valid: number of valid (unpadded) elements per array.
    Returns a list of f32 scalars (one per term).
    """
    arrays = [a for term in term_arrays for a in term]
    input_slices = []
    off = 0
    for term in term_arrays:
        input_slices.append((off, off + len(term)))
        off += len(term)
    n_inputs = off
    n_terms = len(term_arrays)

    rows, lane = arrays[0].shape

    # Block sizing from real dtypes (bf16 inputs get 2x rows per block for free).
    bytes_per_row_all = sum(lane * int(a.dtype.itemsize) for a in arrays)
    max_itemsize = max(int(a.dtype.itemsize) for a in arrays)
    bm = min(_TARGET_BLOCK_BYTES // (lane * max_itemsize),
             _VMEM_DB_INPUT_BUDGET // (2 * bytes_per_row_all),
             rows)
    bm = max(8, (bm // 8) * 8)

    total_blocks = pl.cdiv(rows, bm)
    n_split = 2 if total_blocks >= 2 else 1          # use both TCs on v7x
    steps = pl.cdiv(total_blocks, n_split)
    # Mask when the grid's element coverage exceeds the valid element count
    # (partial last row, partial last block, or duplicated clamped tail blocks).
    need_mask = (n_split * steps * bm * lane) != size_valid

    def in_map(s, i, _steps=steps, _last=total_blocks - 1):
        # Clamp so every DMA stays in bounds; clamped duplicates are masked in-kernel.
        return (jnp.minimum(s * _steps + i, _last), 0)

    kernel = functools.partial(
        _multi_sum_kernel, elem_fns=tuple(term_elem_fns),
        input_slices=tuple(input_slices), n_inputs=n_inputs, n_terms=n_terms,
        block_rows=bm, steps=steps, size_valid=size_valid, need_mask=need_mask)

    # Advisory cost estimate: kernel is purely HBM-bandwidth bound.
    n_elems = rows * lane
    bytes_accessed = (sum(int(a.size) * int(a.dtype.itemsize) for a in arrays)
                      + n_terms * n_split * 8 * lane * 4)
    cost = pl.CostEstimate(
        flops=10 * n_inputs * n_elems,
        transcendentals=2 * n_elems * max(1, n_inputs // 3),
        bytes_accessed=bytes_accessed)

    partials = pl.pallas_call(
        kernel,
        out_shape=tuple(jax.ShapeDtypeStruct((n_split * 8, lane), jnp.float32)
                        for _ in range(n_terms)),
        grid_spec=pltpu.PrefetchScalarGridSpec(
            num_scalar_prefetch=0,
            grid=(n_split, steps),
            in_specs=[pl.BlockSpec((bm, lane), in_map) for _ in range(n_inputs)],
            out_specs=tuple(pl.BlockSpec((8, lane), lambda s, i: (s, 0))
                            for _ in range(n_terms)),
            scratch_shapes=[pltpu.VMEM((8, lane), jnp.float32)
                            for _ in range(n_terms)],
        ),
        compiler_params=pltpu.CompilerParams(
            dimension_semantics=("parallel", "arbitrary"),
            vmem_limit_bytes=_VMEM_LIMIT_BYTES),
        cost_estimate=cost,
    )(*arrays)

    return [jnp.sum(p, dtype=jnp.float32) for p in partials]


# ----------------------------------------------------------------------------
# Per-element functions (upcast to f32 in-kernel; bf16 inputs supported)
# ----------------------------------------------------------------------------
def _vid_elem_fn(*blocks, epsilon, n_layers):
    """Sum over fused layers of: log(std')/2 + (mu-tl)^2 / (2*std')."""
    total = None
    for l in range(n_layers):
        mu = blocks[3 * l].astype(jnp.float32)
        std = blocks[3 * l + 1].astype(jnp.float32) * 0.001 + epsilon
        tl = blocks[3 * l + 2].astype(jnp.float32)
        diff = mu - tl
        r = pl.reciprocal(std, approx=True)   # EUP (free slot)
        r = r * (2.0 - std * r)               # one Newton step on VPU for exact parity
        elem = 0.5 * (jnp.log(std) + diff * diff * r)
        total = elem if total is None else total + elem
    return total


def _l1_elem_fn(a, b):
    return jnp.abs(a.astype(jnp.float32) - b.astype(jnp.float32))


# ----------------------------------------------------------------------------
# Layout plumbing
# ----------------------------------------------------------------------------
def _to_lane_dense(x):
    """Flatten to (rows, 128). Pads ONLY when size % 128 != 0 (or rows < 8); the
    in-kernel flat-index mask makes pad values irrelevant, so no std_pad trickery."""
    flat = x.reshape(-1)
    size = flat.shape[0]
    rows = max(_round_up(size, _LANE) // _LANE, 8)
    padded = rows * _LANE
    if padded != size:
        flat = jnp.pad(flat, (0, padded - size))
    return flat.reshape(rows, _LANE)


# ----------------------------------------------------------------------------
# Forward
# ----------------------------------------------------------------------------
def vid_loss_forward(teacher_pred_dict, student_pred_dict, HR, *,
                     pdf="gaussian", lambda1=1.0, lambda2=1.0,
                     epsilon=1e-8, reduction="mean"):
    """Mirrors VIDLoss.forward (gaussian pdf, mean reduction)."""
    assert pdf == "gaussian", "only gaussian pdf implemented"
    assert reduction == "mean", "only mean reduction implemented"
    # TODO(synk): 'laplace' pdf and 'none'/'sum' reductions not implemented.

    # Collect distillation layers in the order the PyTorch loop visits them.
    layers = []
    for k in student_pred_dict:
        if "mean" in k and "sub" not in k and "add" not in k:
            ln = k.split("_mean")[0]
            layers.append((student_pred_dict[f"{ln}_mean"],
                           student_pred_dict[f"{ln}_var"],
                           teacher_pred_dict[ln]))

    # Fuse layers that share a shape into one pallas_call.
    groups = {}
    for mu, std, tl in layers:
        groups.setdefault(tuple(mu.shape), []).append((mu, std, tl))

    hr = student_pred_dict["hr"]
    hr_shape = tuple(hr.shape)
    hr_elems = math.prod(hr_shape)

    distill_loss = jnp.float32(0.0)
    gt_loss = None
    gt_pending = True

    for shape, group in groups.items():
        n_layers = len(group)
        c = shape[1]
        n_elem = math.prod(shape)

        distill_arrays = []
        for mu, std, tl in group:
            distill_arrays.append(_to_lane_dense(mu))
            distill_arrays.append(_to_lane_dense(std))
            distill_arrays.append(_to_lane_dense(tl))

        term_arrays = [distill_arrays]
        term_fns = [functools.partial(_vid_elem_fn, epsilon=epsilon,
                                      n_layers=n_layers)]

        fuse_gt = gt_pending and (shape == hr_shape)
        if fuse_gt:  # gt L1 term rides along in the same pallas_call (shared shape)
            term_arrays.append([_to_lane_dense(hr), _to_lane_dense(HR)])
            term_fns.append(_l1_elem_fn)

        sums = _tiled_multi_sum(term_arrays, term_fns, size_valid=n_elem)

        const = n_layers * c * math.log(2.0 * math.pi) / 2.0  # per-element constants
        distill_loss = distill_loss + sums[0] / float(n_elem) + const

        if fuse_gt:
            gt_loss = sums[1] / float(hr_elems)
            gt_pending = False

    if gt_pending:  # hr/HR shape did not match any distill group (or no layers)
        sums = _tiled_multi_sum([[_to_lane_dense(hr), _to_lane_dense(HR)]],
                                [_l1_elem_fn], size_valid=hr_elems)
        gt_loss = sums[0] / float(hr_elems)

    loss_dict = {
        "loss": lambda1 * gt_loss + lambda2 * distill_loss,
        "gt_loss": lambda1 * gt_loss,
        "distill_loss": lambda2 * distill_loss,
    }
    return loss_dict


# ----------------------------------------------------------------------------
# Pure-JAX reference for a sanity check
# ----------------------------------------------------------------------------
def _ref_forward(teacher, student, HR, epsilon=1e-8):
    distill = 0.0
    for k in student:
        if "mean" in k and "sub" not in k and "add" not in k:
            ln = k.split("_mean")[0]
            mu = student[f"{ln}_mean"].astype(jnp.float32)
            std = student[f"{ln}_var"].astype(jnp.float32) * 0.001 + epsilon
            tl = teacher[ln].astype(jnp.float32)
            elem = (mu.shape[1] * math.log(2 * math.pi) / 2.0
                    + jnp.log(std) / 2.0
                    + (mu - tl) ** 2 / (2.0 * std))
            distill = distill + jnp.mean(elem)
    gt = jnp.mean(jnp.abs(student["hr"].astype(jnp.float32) - HR.astype(jnp.float32)))
    return {"loss": gt + distill, "gt_loss": gt, "distill_loss": distill}


# ----------------------------------------------------------------------------
# Main
# ----------------------------------------------------------------------------
if __name__ == "__main__":
    key = jax.random.PRNGKey(0)
    B, C, H, W = 2, 4, 16, 16

    keys = jax.random.split(key, 8)
    teacher = {
        "layer1": jax.random.normal(keys[0], (B, C, H, W), jnp.float32),
        "layer2": jax.random.normal(keys[1], (B, C, H, W), jnp.float32),
    }
    student = {
        "hr": jax.random.normal(keys[2], (B, C, H, W), jnp.float32),
        "layer1_mean": jax.random.normal(keys[3], (B, C, H, W), jnp.float32),
        # variance kept strictly positive, as a softplus/var head would produce
        "layer1_var": jax.random.uniform(keys[4], (B, C, H, W), jnp.float32, 0.1, 1.0),
        "layer2_mean": jax.random.normal(keys[5], (B, C, H, W), jnp.float32),
        "layer2_var": jax.random.uniform(keys[6], (B, C, H, W), jnp.float32, 0.1, 1.0),
    }
    HR = jax.random.normal(keys[7], (B, C, H, W), jnp.float32)

    out = vid_loss_forward(teacher, student, HR)
    out = jax.tree_util.tree_map(jax.block_until_ready, out)

    ref = _ref_forward(teacher, student, HR)
    for name in ("loss", "gt_loss", "distill_loss"):
        a = float(out[name])
        b = float(ref[name])
        assert abs(a - b) <= 1e-3 * max(1.0, abs(b)), (name, a, b)

    print("KERNEL_OK")
</pallas_src>

<mosaic_0001>
module attributes {stable_mosaic.version = 11 : i64} {
  func.func @_multi_sum_kernel(%arg0: i32, %arg1: i32, %arg2: memref<16x128xf32, #tpu.memory_space<vmem>>, %arg3: memref<16x128xf32, #tpu.memory_space<vmem>>, %arg4: memref<16x128xf32, #tpu.memory_space<vmem>>, %arg5: memref<16x128xf32, #tpu.memory_space<vmem>>, %arg6: memref<16x128xf32, #tpu.memory_space<vmem>>, %arg7: memref<16x128xf32, #tpu.memory_space<vmem>>, %arg8: memref<16x128xf32, #tpu.memory_space<vmem>>, %arg9: memref<16x128xf32, #tpu.memory_space<vmem>>, %arg10: memref<8x128xf32, #tpu.memory_space<vmem>>, %arg11: memref<8x128xf32, #tpu.memory_space<vmem>>, %arg12: memref<8x128xf32, #tpu.memory_space<vmem>>, %arg13: memref<8x128xf32, #tpu.memory_space<vmem>>) attributes {dimension_semantics = [#tpu.dimension_semantics<parallel>, #tpu.dimension_semantics<arbitrary>], iteration_bounds = array<i64: 1, 1>, scalar_prefetch = 0 : i64, scratch_operands = 2 : i64, tpu.core_type = #tpu.core_type<tc>, window_params = [{transform_indices = @transform_0, window_bounds = array<i64: 16, 128>}, {transform_indices = @transform_1, window_bounds = array<i64: 16, 128>}, {transform_indices = @transform_2, window_bounds = array<i64: 16, 128>}, {transform_indices = @transform_3, window_bounds = array<i64: 16, 128>}, {transform_indices = @transform_4, window_bounds = array<i64: 16, 128>}, {transform_indices = @transform_5, window_bounds = array<i64: 16, 128>}, {transform_indices = @transform_6, window_bounds = array<i64: 16, 128>}, {transform_indices = @transform_7, window_bounds = array<i64: 16, 128>}, {transform_indices = @transform_8, window_bounds = array<i64: 8, 128>}, {transform_indices = @transform_9, window_bounds = array<i64: 8, 128>}]} {
    %c0_i32 = arith.constant 0 : i32
    %0 = arith.cmpi eq, %arg1, %c0_i32 : i32
    %1 = arith.extui %0 : i1 to i32
    %c0_i32_0 = arith.constant 0 : i32
    %2 = arith.cmpi ne, %1, %c0_i32_0 : i32
    scf.if %2 {
      %cst_35 = arith.constant 0.000000e+00 : f32
      %59 = vector.broadcast %cst_35 : f32 to vector<8x128xf32>
      %c0_36 = arith.constant 0 : index
      %c0_37 = arith.constant 0 : index
      %60 = vector.load %arg12[%c0_36, %c0_37] : memref<8x128xf32, #tpu.memory_space<vmem>>, vector<8x128xf32>
      tpu.vector_store %arg12[%c0_36, %c0_37], %59 {strides = array<i32>} : memref<8x128xf32, #tpu.memory_space<vmem>>, vector<8x128xf32>,
      %cst_38 = arith.constant 0.000000e+00 : f32
      %61 = vector.broadcast %cst_38 : f32 to vector<8x128xf32>
      %c0_39 = arith.constant 0 : index
      %c0_40 = arith.constant 0 : index
      %62 = vector.load %arg13[%c0_39, %c0_40] : memref<8x128xf32, #tpu.memory_space<vmem>>, vector<8x128xf32>
      tpu.vector_store %arg13[%c0_39, %c0_40], %61 {strides = array<i32>} : memref<8x128xf32, #tpu.memory_space<vmem>>, vector<8x128xf32>,
    } else {
    }
    %c0 = arith.constant 0 : index
    %c0_1 = arith.constant 0 : index
    %3 = vector.load %arg2[%c0, %c0_1] : memref<16x128xf32, #tpu.memory_space<vmem>>, vector<16x128xf32>
    %c0_2 = arith.constant 0 : index
    %c0_3 = arith.constant 0 : index
    %4 = vector.load %arg3[%c0_2, %c0_3] : memref<16x128xf32, #tpu.memory_space<vmem>>, vector<16x128xf32>
    %c0_4 = arith.constant 0 : index
    %c0_5 = arith.constant 0 : index
    %5 = vector.load %arg4[%c0_4, %c0_5] : memref<16x128xf32, #tpu.memory_space<vmem>>, vector<16x128xf32>
    %c0_6 = arith.constant 0 : index
    %c0_7 = arith.constant 0 : index
    %6 = vector.load %arg5[%c0_6, %c0_7] : memref<16x128xf32, #tpu.memory_space<vmem>>, vector<16x128xf32>
    %c0_8 = arith.constant 0 : index
    %c0_9 = arith.constant 0 : index
    %7 = vector.load %arg6[%c0_8, %c0_9] : memref<16x128xf32, #tpu.memory_space<vmem>>, vector<16x128xf32>
    %c0_10 = arith.constant 0 : index
    %c0_11 = arith.constant 0 : index
    %8 = vector.load %arg7[%c0_10, %c0_11] : memref<16x128xf32, #tpu.memory_space<vmem>>, vector<16x128xf32>
    %cst = arith.constant 1.000000e-03 : f32
    %9 = vector.broadcast %cst : f32 to vector<16x128xf32>
    %10 = arith.mulf %4, %9 : vector<16x128xf32>
    %cst_12 = arith.constant 9.99999993E-9 : f32
    %11 = vector.broadcast %cst_12 : f32 to vector<16x128xf32>
    %12 = arith.addf %10, %11 : vector<16x128xf32>
    %13 = arith.subf %3, %5 : vector<16x128xf32>
    %14 = tpu.reciprocal %12 {approx = true} : vector<16x128xf32> -> vector<16x128xf32>
    %15 = arith.mulf %12, %14 : vector<16x128xf32>
    %cst_13 = arith.constant 2.000000e+00 : f32
    %16 = vector.broadcast %cst_13 : f32 to vector<16x128xf32>
    %17 = arith.subf %16, %15 : vector<16x128xf32>
    %18 = arith.mulf %14, %17 : vector<16x128xf32>
    %19 = math.log %12 : vector<16x128xf32>
    %20 = arith.mulf %13, %13 : vector<16x128xf32>
    %21 = arith.mulf %20, %18 : vector<16x128xf32>
    %22 = arith.addf %19, %21 : vector<16x128xf32>
    %cst_14 = arith.constant 5.000000e-01 : f32
    %23 = vector.broadcast %cst_14 : f32 to vector<16x128xf32>
    %24 = arith.mulf %23, %22 : vector<16x128xf32>
    %cst_15 = arith.constant 1.000000e-03 : f32
    %25 = vector.broadcast %cst_15 : f32 to vector<16x128xf32>
    %26 = arith.mulf %7, %25 : vector<16x128xf32>
    %cst_16 = arith.constant 9.99999993E-9 : f32
    %27 = vector.broadcast %cst_16 : f32 to vector<16x128xf32>
    %28 = arith.addf %26, %27 : vector<16x128xf32>
    %29 = arith.subf %6, %8 : vector<16x128xf32>
    %30 = tpu.reciprocal %28 {approx = true} : vector<16x128xf32> -> vector<16x128xf32>
    %31 = arith.mulf %28, %30 : vector<16x128xf32>
    %cst_17 = arith.constant 2.000000e+00 : f32
    %32 = vector.broadcast %cst_17 : f32 to vector<16x128xf32>
    %33 = arith.subf %32, %31 : vector<16x128xf32>
    %34 = arith.mulf %30, %33 : vector<16x128xf32>
    %35 = math.log %28 : vector<16x128xf32>
    %36 = arith.mulf %29, %29 : vector<16x128xf32>
    %37 = arith.mulf %36, %34 : vector<16x128xf32>
    %38 = arith.addf %35, %37 : vector<16x128xf32>
    %cst_18 = arith.constant 5.000000e-01 : f32
    %39 = vector.broadcast %cst_18 : f32 to vector<16x128xf32>
    %40 = arith.mulf %39, %38 : vector<16x128xf32>
    %41 = arith.addf %24, %40 : vector<16x128xf32>
    %c0_19 = arith.constant 0 : index
    %c0_20 = arith.constant 0 : index
    %42 = vector.load %arg12[%c0_19, %c0_20] : memref<8x128xf32, #tpu.memory_space<vmem>>, vector<8x128xf32>
    %43 = vector.shape_cast %41 : vector<16x128xf32> to vector<2x8x128xf32>
    %cst_21 = arith.constant dense<0.000000e+00> : vector<8x128xf32>
    %44 = vector.multi_reduction <add>, %43, %cst_21 [0] : vector<2x8x128xf32> to vector<8x128xf32>
    %45 = arith.addf %42, %44 : vector<8x128xf32>
    %c0_22 = arith.constant 0 : index
    %c0_23 = arith.constant 0 : index
    %46 = vector.load %arg12[%c0_22, %c0_23] : memref<8x128xf32, #tpu.memory_space<vmem>>, vector<8x128xf32>
    tpu.vector_store %arg12[%c0_22, %c0_23], %45 {strides = array<i32>} : memref<8x128xf32, #tpu.memory_space<vmem>>, vector<8x128xf32>,
    %c0_24 = arith.constant 0 : index
    %c0_25 = arith.constant 0 : index
    %47 = vector.load %arg8[%c0_24, %c0_25] : memref<16x128xf32, #tpu.memory_space<vmem>>, vector<16x128xf32>
    %c0_26 = arith.constant 0 : index
    %c0_27 = arith.constant 0 : index
    %48 = vector.load %arg9[%c0_26, %c0_27] : memref<16x128xf32, #tpu.memory_space<vmem>>, vector<16x128xf32>
    %49 = arith.subf %47, %48 : vector<16x128xf32>
    %50 = math.absf %49 : vector<16x128xf32>
    %c0_28 = arith.constant 0 : index
    %c0_29 = arith.constant 0 : index
    %51 = vector.load %arg13[%c0_28, %c0_29] : memref<8x128xf32, #tpu.memory_space<vmem>>, vector<8x128xf32>
    %52 = vector.shape_cast %50 : vector<16x128xf32> to vector<2x8x128xf32>
    %cst_30 = arith.constant dense<0.000000e+00> : vector<8x128xf32>
    %53 = vector.multi_reduction <add>, %52, %cst_30 [0] : vector<2x8x128xf32> to vector<8x128xf32>
    %54 = arith.addf %51, %53 : vector<8x128xf32>
    %c0_31 = arith.constant 0 : index
    %c0_32 = arith.constant 0 : index
    %55 = vector.load %arg13[%c0_31, %c0_32] : memref<8x128xf32, #tpu.memory_space<vmem>>, vector<8x128xf32>
    tpu.vector_store %arg13[%c0_31, %c0_32], %54 {strides = array<i32>} : memref<8x128xf32, #tpu.memory_space<vmem>>, vector<8x128xf32>,
    %c0_i32_33 = arith.constant 0 : i32
    %56 = arith.cmpi eq, %arg1, %c0_i32_33 : i32
    %57 = arith.extui %56 : i1 to i32
    %c0_i32_34 = arith.constant 0 : i32
    %58 = arith.cmpi ne, %57, %c0_i32_34 : i32
    scf.if %58 {
      %c0_35 = arith.constant 0 : index
      %c0_36 = arith.constant 0 : index
      %59 = vector.load %arg12[%c0_35, %c0_36] : memref<8x128xf32, #tpu.memory_space<vmem>>, vector<8x128xf32>
      %c0_37 = arith.constant 0 : index
      %c0_38 = arith.constant 0 : index
      %60 = vector.load %arg10[%c0_37, %c0_38] : memref<8x128xf32, #tpu.memory_space<vmem>>, vector<8x128xf32>
      tpu.vector_store %arg10[%c0_37, %c0_38], %59 {strides = array<i32>} : memref<8x128xf32, #tpu.memory_space<vmem>>, vector<8x128xf32>,
      %c0_39 = arith.constant 0 : index
      %c0_40 = arith.constant 0 : index
      %61 = vector.load %arg13[%c0_39, %c0_40] : memref<8x128xf32, #tpu.memory_space<vmem>>, vector<8x128xf32>
      %c0_41 = arith.constant 0 : index
      %c0_42 = arith.constant 0 : index
      %62 = vector.load %arg11[%c0_41, %c0_42] : memref<8x128xf32, #tpu.memory_space<vmem>>, vector<8x128xf32>
      tpu.vector_store %arg11[%c0_41, %c0_42], %61 {strides = array<i32>} : memref<8x128xf32, #tpu.memory_space<vmem>>, vector<8x128xf32>,
    } else {
    }
    return
  }
  func.func @transform_0(%arg0: i32, %arg1: i32) -> (i32, i32) {
    %c1_i32 = arith.constant 1 : i32
    %0 = arith.muli %arg0, %c1_i32 : i32
    %1 = arith.addi %0, %arg1 : i32
    %c0_i32 = arith.constant 0 : i32
    %2 = arith.minsi %1, %c0_i32 : i32
    %c0_i32_0 = arith.constant 0 : i32
    %c0_i32_1 = arith.constant 0 : i32
    return %2, %c0_i32_0 : i32, i32
  }
  func.func @transform_1(%arg0: i32, %arg1: i32) -> (i32, i32) {
    %c1_i32 = arith.constant 1 : i32
    %0 = arith.muli %arg0, %c1_i32 : i32
    %1 = arith.addi %0, %arg1 : i32
    %c0_i32 = arith.constant 0 : i32
    %2 = arith.minsi %1, %c0_i32 : i32
    %c0_i32_0 = arith.constant 0 : i32
    %c0_i32_1 = arith.constant 0 : i32
    return %2, %c0_i32_0 : i32, i32
  }
  func.func @transform_2(%arg0: i32, %arg1: i32) -> (i32, i32) {
    %c1_i32 = arith.constant 1 : i32
    %0 = arith.muli %arg0, %c1_i32 : i32
    %1 = arith.addi %0, %arg1 : i32
    %c0_i32 = arith.constant 0 : i32
    %2 = arith.minsi %1, %c0_i32 : i32
    %c0_i32_0 = arith.constant 0 : i32
    %c0_i32_1 = arith.constant 0 : i32
    return %2, %c0_i32_0 : i32, i32
  }
  func.func @transform_3(%arg0: i32, %arg1: i32) -> (i32, i32) {
    %c1_i32 = arith.constant 1 : i32
    %0 = arith.muli %arg0, %c1_i32 : i32
    %1 = arith.addi %0, %arg1 : i32
    %c0_i32 = arith.constant 0 : i32
    %2 = arith.minsi %1, %c0_i32 : i32
    %c0_i32_0 = arith.constant 0 : i32
    %c0_i32_1 = arith.constant 0 : i32
    return %2, %c0_i32_0 : i32, i32
  }
  func.func @transform_4(%arg0: i32, %arg1: i32) -> (i32, i32) {
    %c1_i32 = arith.constant 1 : i32
    %0 = arith.muli %arg0, %c1_i32 : i32
    %1 = arith.addi %0, %arg1 : i32
    %c0_i32 = arith.constant 0 : i32
    %2 = arith.minsi %1, %c0_i32 : i32
    %c0_i32_0 = arith.constant 0 : i32
    %c0_i32_1 = arith.constant 0 : i32
    return %2, %c0_i32_0 : i32, i32
  }
  func.func @transform_5(%arg0: i32, %arg1: i32) -> (i32, i32) {
    %c1_i32 = arith.constant 1 : i32
    %0 = arith.muli %arg0, %c1_i32 : i32
    %1 = arith.addi %0, %arg1 : i32
    %c0_i32 = arith.constant 0 : i32
    %2 = arith.minsi %1, %c0_i32 : i32
    %c0_i32_0 = arith.constant 0 : i32
    %c0_i32_1 = arith.constant 0 : i32
    return %2, %c0_i32_0 : i32, i32
  }
  func.func @transform_6(%arg0: i32, %arg1: i32) -> (i32, i32) {
    %c1_i32 = arith.constant 1 : i32
    %0 = arith.muli %arg0, %c1_i32 : i32
    %1 = arith.addi %0, %arg1 : i32
    %c0_i32 = arith.constant 0 : i32
    %2 = arith.minsi %1, %c0_i32 : i32
    %c0_i32_0 = arith.constant 0 : i32
    %c0_i32_1 = arith.constant 0 : i32
    return %2, %c0_i32_0 : i32, i32
  }
  func.func @transform_7(%arg0: i32, %arg1: i32) -> (i32, i32) {
    %c1_i32 = arith.constant 1 : i32
    %0 = arith.muli %arg0, %c1_i32 : i32
    %1 = arith.addi %0, %arg1 : i32
    %c0_i32 = arith.constant 0 : i32
    %2 = arith.minsi %1, %c0_i32 : i32
    %c0_i32_0 = arith.constant 0 : i32
    %c0_i32_1 = arith.constant 0 : i32
    return %2, %c0_i32_0 : i32, i32
  }
  func.func @transform_8(%arg0: i32, %arg1: i32) -> (i32, i32) {
    %c0_i32 = arith.constant 0 : i32
    %c0_i32_0 = arith.constant 0 : i32
    return %arg0, %c0_i32 : i32, i32
  }
  func.func @transform_9(%arg0: i32, %arg1: i32) -> (i32, i32) {
    %c0_i32 = arith.constant 0 : i32
    %c0_i32_0 = arith.constant 0 : i32
    return %arg0, %c0_i32 : i32, i32
  }
}

</mosaic_0001>

<bundles_post_ra>
// kernel: tpu_custom_call.1
= control target key start
LH: loop header
LB: loop body
LE: loop exit
PB: predicated region body
PF: predicated region fallthrough
CT: control target
= control target key end

     0   :  { %15 = vsyncpa [#allocation5], 0  ;;  %s784_s0 = inlined_call_operand.hbm [shape: f32[16,128], index: 0, kind: input, shape index: {}]   ;;  %s785_s1 = inlined_call_operand.hbm [shape: f32[16,128], index: 1, kind: input, shape index: {}]   ;;  %s786_s2 = inlined_call_operand.hbm [shape: f32[16,128], index: 2, kind: input, shape index: {}]   ;;  %s787_s3 = inlined_call_operand.hbm [shape: f32[16,128], index: 3, kind: input, shape index: {}]   ;;  %s788_s4 = inlined_call_operand.hbm [shape: f32[16,128], index: 4, kind: input, shape index: {}]   ;;  %s789_s5 = inlined_call_operand.hbm [shape: f32[16,128], index: 5, kind: input, shape index: {}]   ;;  %s790_s6 = inlined_call_operand.hbm [shape: f32[16,128], index: 6, kind: input, shape index: {}]   ;;  %s791_s7 = inlined_call_operand.hbm [shape: f32[16,128], index: 7, kind: input, shape index: {}]   ;;  %s792_s8 = inlined_call_operand.hbm [shape: f32[8,128], index: 8, kind: output, shape index: {0}]   ;;  %s793_s9 = inlined_call_operand.hbm [shape: f32[8,128], index: 9, kind: output, shape index: {1}]  }
   0x1   :  { %16 = vsyncpa [#allocation8], 0 }
   0x2   :  { %17 = vsyncpa [#allocation11], 0 }
   0x3   :  { %18 = vsyncpa [#allocation14], 0 }
   0x4   :  { %19 = vsyncpa [#allocation17], 0 }
   0x5   :  { %20 = vsyncpa [#allocation6], 0 }
   0x6   :  { %21 = vsyncpa [#allocation20], 0  ;;  %s51_s11 = sshll.u32 %s785_s1, 4  ;;  %s668_s12 = smov [#allocation7]   ;;  %s52_s11 = int_to_ptr.hbm [resolvable:$true] %s51_s11 }
   0x7   :  { %s53_s13 = sshll.u32 %s668_s12, 4  ;;  %s89_s16 = sshll.u32 %s787_s3, 4  ;;  %s54_s13 = int_to_ptr.vmem [resolvable:$true] %s53_s13  ;;  %s90_s16 = int_to_ptr.hbm [resolvable:$true] %s89_s16 }
   0x8   :  { %s669_s17 = smov 128   ;;  %s670_s18 = smov 8  }
   0x9   :  { %59 = dma.hbm_to_vmem [thread:$0]  %s52_s11, 256, %s54_s13, [#allocation8], %s669_s17, %s669_s17, %s670_s18  }
   0xa   :  { %s671_s19 = smov [#allocation10]   ;;  %s127_s1 = sshll.u32 %s789_s5, 4  ;;  %s128_s1 = int_to_ptr.hbm [resolvable:$true] %s127_s1 }
   0xb   :  { %s91_s20 = sshll.u32 %s671_s19, 4  ;;  %s32_s24 = sshll.u32 %s784_s0, 4  ;;  %s92_s20 = int_to_ptr.vmem [resolvable:$true] %s91_s20  ;;  %s33_s24 = int_to_ptr.hbm [resolvable:$true] %s32_s24 }
   0xc   :  { %97 = dma.hbm_to_vmem [thread:$0]  %s90_s16, 256, %s92_s20, [#allocation11], %s669_s17, %s669_s17, %s670_s18  }
   0xd   :  { %s672_s25 = smov [#allocation13]   ;;  %s673_s27 = smov [#allocation4]  }
   0xe   :  { %s129_s26 = sshll.u32 %s672_s25, 4  ;;  %s34_s5 = sshll.u32 %s673_s27, 4  ;;  %s130_s26 = int_to_ptr.vmem [resolvable:$true] %s129_s26  ;;  %s35_s5 = int_to_ptr.vmem [resolvable:$true] %s34_s5 }
   0xf   :  { %135 = dma.hbm_to_vmem [thread:$0]  %s128_s1, 256, %s130_s26, [#allocation14], %s669_s17, %s669_s17, %s670_s18  }
  0x10   :  { %s70_s30 = sshll.u32 %s786_s2, 4  ;;  %s108_s11 = sshll.u32 %s788_s4, 4  ;;  %s71_s30 = int_to_ptr.hbm [resolvable:$true] %s70_s30  ;;  %s109_s11 = int_to_ptr.hbm [resolvable:$true] %s108_s11 }
  0x11   :  { %40 = dma.hbm_to_vmem [thread:$0]  %s33_s24, 256, %s35_s5, [#allocation5], %s669_s17, %s669_s17, %s670_s18  }
  0x12   :  { %s674_s12 = smov [#allocation9]   ;;  %s675_s14 = smov [#allocation12]  }
  0x13   :  { %s72_s13 = sshll.u32 %s674_s12, 4  ;;  %s110_s2 = sshll.u32 %s675_s14, 4  ;;  %s73_s13 = int_to_ptr.vmem [resolvable:$true] %s72_s13  ;;  %s111_s2 = int_to_ptr.vmem [resolvable:$true] %s110_s2 }
  0x14   :  { %78 = dma.hbm_to_vmem [thread:$0]  %s71_s30, 256, %s73_s13, [#allocation8], %s669_s17, %s669_s17, %s670_s18  }
  0x15   :  { %s146_s19 = sshll.u32 %s790_s6, 4  ;;  %s165_s21 = sshll.u32 %s791_s7, 4  ;;  %s147_s19 = int_to_ptr.hbm [resolvable:$true] %s146_s19  ;;  %s166_s21 = int_to_ptr.hbm [resolvable:$true] %s165_s21 }
  0x16   :  { %116 = dma.hbm_to_vmem [thread:$0]  %s109_s11, 256, %s111_s2, [#allocation11], %s669_s17, %s669_s17, %s670_s18  }
  0x17   :  { %s676_s22 = smov [#allocation15]   ;;  %s677_s3 = smov [#allocation16]  }
  0x18   :  { %s148_s1 = sshll.u32 %s676_s22, 4  ;;  %s167_s6 = sshll.u32 %s677_s3, 4  ;;  %s149_s1 = int_to_ptr.vmem [resolvable:$true] %s148_s1  ;;  %s168_s6 = int_to_ptr.vmem [resolvable:$true] %s167_s6 }
  0x19   :  { %154 = dma.hbm_to_vmem [thread:$0]  %s147_s19, 256, %s149_s1, [#allocation14], %s669_s17, %s669_s17, %s670_s18  }
  0x1a   :  { %173 = dma.hbm_to_vmem [thread:$0]  %s166_s21, 256, %s168_s6, [#allocation17], %s669_s17, %s669_s17, %s670_s18  }
  0x1b   :  { %654 = dma.done.wait [#allocation5], 256  }
  0x1c   :  { %655 = vsyncadd [#allocation5], 4294967040 }
  0x1d   :  { %656 = dma.done.wait [#allocation8], 512  }
  0x1e   :  { %657 = vsyncadd [#allocation8], 4294966784 }
  0x1f   :  { %658 = dma.done.wait [#allocation11], 512  }
  0x20   :  { %659 = vsyncadd [#allocation11], 4294966784 }
  0x21   :  { %660 = dma.done.wait [#allocation14], 512  }
  0x22   :  { %661 = vsyncadd [#allocation14], 4294966784 }
  0x23   :  { %662 = dma.done.wait [#allocation17], 256  }
  0x24   :  { %663 = vsyncadd [#allocation17], 4294967040  ;;  %v246_v0 = vld [vmem:[#allocation7] sm:$0xff]  ;;  %v247_v1 = vld [vmem:[#allocation7 + $0x8] sm:$0xff]  ;;  %s678_s7 = smov [#allocation19]   ;;  %s351_s24 = sshll.u32 %s793_s9, 4  ;;  %s352_s24 = int_to_ptr.hbm [resolvable:$true] %s351_s24 }
  0x25   :  { %v256_v2 = vmul.f32 0.001, %v246_v0  ;;  %v252_v3 = vld [vmem:[#allocation12] sm:$0xff]  ;;  %v257_v4 = vmul.f32 0.001, %v247_v1  ;;  %v253_v5 = vld [vmem:[#allocation12 + $0x8] sm:$0xff] }
  0x26   :  { %v282_v8 = vmul.f32 0.001, %v252_v3  ;;  %v314_v9 = vld [vmem:[#allocation15] sm:$0xff]  ;;  %v315_v10 = vld [vmem:[#allocation15 + $0x8] sm:$0xff]  ;;  %v283_v11 = vmul.f32 0.001, %v253_v5 }
  0x27   :  { %v258_v6 = vadd.f32 1e-08, %v256_v2  ;;  %v259_v7 = vadd.f32 1e-08, %v257_v4  ;;  %v316_v12 = vld [vmem:[#allocation16] sm:$0xff]  ;;  %v317_v13 = vld [vmem:[#allocation16 + $0x8] sm:$0xff] }
  0x28   :  { %v284_v14 = vadd.f32 1e-08, %v282_v8  ;;  %v318_v15 = vsub.f32 %v314_v9, %v316_v12  ;;  %v319_v16 = vsub.f32 %v315_v10, %v317_v13  ;;  %v244_v17 = vld [vmem:[#allocation4] sm:$0xff]  ;;  %v285_v19 = vadd.f32 1e-08, %v283_v11  ;;  %s349_s17 = sshll.u32 %s678_s7, 4  ;;  %s350_s17 = int_to_ptr.vmem [resolvable:$true] %s349_s17 }
  0x29   :  { %398 = vrcp.f32 %v258_v6  ;;  %v248_v18 = vld [vmem:[#allocation9] sm:$0xff]  ;;  %v245_v20 = vld [vmem:[#allocation4 + $0x8] sm:$0xff]  ;;  %v250_v27 = vld [vmem:[#allocation10] sm:$0xff]  ;;  %s679_s9 = smov [#allocation18]   ;;  %s340_s5 = sshll.u32 %s792_s8, 4  ;;  %s341_s5 = int_to_ptr.hbm [resolvable:$true] %s340_s5 }
  0x2a   :  { %400 = vrcp.f32 %v259_v7  ;;  %v249_v21 = vld [vmem:[#allocation9 + $0x8] sm:$0xff]  ;;  %v320_v22 = vand.u32 2147483647, %v318_v15  ;;  %v321_v23 = vand.u32 2147483647, %v319_v16  ;;  %v260_v24 = vsub.f32 %v244_v17, %v248_v18  ;;  %v254_v28 = vld [vmem:[#allocation13] sm:$0xff] }
  0x2b   :  { %402 = vlog2.f32 %v258_v6  ;;  %v261_v29 = vsub.f32 %v245_v20, %v249_v21  ;;  %v251_v31 = vld [vmem:[#allocation10 + $0x8] sm:$0xff]  ;;  %v286_v39 = vsub.f32 %v250_v27, %v254_v28  ;;  %s338_s25 = sshll.u32 %s679_s9, 4  ;;  %s339_s25 = int_to_ptr.vmem [resolvable:$true] %s338_s25 }
  0x2c   :  { %404 = vlog2.f32 %v259_v7  ;;  %v323_v25 = vadd.f32 %v321_v23, %v320_v22  ;;  %v255_v32 = vld [vmem:[#allocation13 + $0x8] sm:$0xff]  ;;  %v274_v38 = vmul.f32 %v260_v24, %v260_v24 }
  0x2d   :  { %406 = vrcp.f32 %v284_v14  ;;  %v275_v42 = vmul.f32 %v261_v29, %v261_v29  ;;  %v287_v43 = vsub.f32 %v251_v31, %v255_v32  ;;  %v300_v55 = vmul.f32 %v286_v39, %v286_v39 }
  0x2e   :  { %408 = vrcp.f32 %v285_v19  ;;  %332 = vst [vmem:[#allocation19] sm:$0xff] %v323_v25 }
  0x2f   :  { %v399_v26 = vpop.eup %398  ;;  %410 = vlog2.f32 %v284_v14  ;;  %354 = dma.vmem_to_hbm [thread:$0]  %s350_s17, 128, %s352_s24, [#allocation20]   ;;  %v301_v58 = vmul.f32 %v287_v43, %v287_v43 }
  0x30   :  { %v401_v30 = vpop.eup %400  ;;  %v264_v33 = vmul.f32 %v399_v26, %v258_v6  ;;  %412 = vlog2.f32 %v285_v19 }
  0x31   :  { %v403_v34 = vpop.eup %402  ;;  %v265_v35 = vmul.f32 %v401_v30, %v259_v7 }
  0x32   :  { %v405_v36 = vpop.eup %404  ;;  %v266_v37 = vsub.f32 2.0, %v264_v33  ;;  %v271_v46 = vmul.f32 0.6931472, %v403_v34 }
  0x33   :  { %v407_v40 = vpop.eup %406  ;;  %v267_v41 = vsub.f32 2.0, %v265_v35  ;;  %v273_v50 = vmul.f32 0.6931472, %v405_v36 }
  0x34   :  { %v409_v44 = vpop.eup %408  ;;  %v268_v45 = vmul.f32 %v399_v26, %v266_v37  ;;  %v290_v47 = vmul.f32 %v407_v40, %v284_v14 }
  0x35   :  { %v411_v48 = vpop.eup %410  ;;  %v269_v49 = vmul.f32 %v401_v30, %v267_v41  ;;  %v291_v51 = vmul.f32 %v409_v44, %v285_v19 }
  0x36   :  { %v413_v52 = vpop.eup %412  ;;  %v276_v53 = vmul.f32 %v274_v38, %v268_v45  ;;  %v292_v54 = vsub.f32 2.0, %v290_v47  ;;  %v297_v61 = vmul.f32 0.6931472, %v411_v48 }
  0x37   :  { %v277_v56 = vmul.f32 %v275_v42, %v269_v49  ;;  %v293_v57 = vsub.f32 2.0, %v291_v51  ;;  %v299_v0 = vmul.f32 0.6931472, %v413_v52 }
  0x38   :  { %v278_v59 = vadd.f32 %v276_v53, %v271_v46  ;;  %v294_v60 = vmul.f32 %v407_v40, %v292_v54 }
  0x39   :  { %v279_v62 = vadd.f32 %v277_v56, %v273_v50  ;;  %v295_v63 = vmul.f32 %v409_v44, %v293_v57 }
  0x3a   :  { %v302_v1 = vmul.f32 %v300_v55, %v294_v60  ;;  %v280_v3 = vmul.f32 0.5, %v278_v59 }
  0x3b   :  { %v303_v2 = vmul.f32 %v301_v58, %v295_v63  ;;  %v281_v5 = vmul.f32 0.5, %v279_v62 }
  0x3c   :  { %v304_v4 = vadd.f32 %v302_v1, %v297_v61 }
  0x3d   :  { %v305_v6 = vadd.f32 %v303_v2, %v299_v0 }
  0x3e   :  { %v306_v7 = vmul.f32 0.5, %v304_v4 }
  0x3f   :  { %v307_v8 = vmul.f32 0.5, %v305_v6 }
  0x40   :  { %v308_v9 = vadd.f32 %v306_v7, %v280_v3 }
  0x41   :  { %v309_v10 = vadd.f32 %v307_v8, %v281_v5 }
  0x43   :  { %v311_v11 = vadd.f32 %v309_v10, %v308_v9 }
  0x45   :  { %330 = vst [vmem:[#allocation18] sm:$0xff] %v311_v11 }
  0x46   :  { %343 = dma.vmem_to_hbm [thread:$0]  %s339_s25, 128, %s341_s5, [#allocation6]  }
  0x47   :  { %664 = dma.done.wait [#allocation6], 128  }
  0x48   :  { %665 = vsyncadd [#allocation6], 4294967168 }
  0x49   :  { %666 = dma.done.wait [#allocation20], 128  }
  0x4a   :  { %667 = vsyncadd [#allocation20], 4294967168 }
  0x4b   :  { %363 = vsyncpa [#allocation5], 1 }
  0x4c   :  { %364 = vsyncpa [#allocation8], 1 }
  0x4d   :  { %365 = vsyncpa [#allocation11], 1 }
  0x4e   :  { %366 = vsyncpa [#allocation14], 1 }
  0x4f   :  { %367 = vsyncpa [#allocation17], 1 }
  0x50   :  { %368 = vsyncpa [#allocation6], 1 }
  0x51   :  { %369 = vsyncpa [#allocation20], 1 }

</bundles_post_ra>
